<compile_context>
chip_gen: v6e
topology: v6e:2x2x1
jax: 0.10.0
libtpu: 0.0.40
codegen_flags: <defaults>
</compile_context>

<pallas_src>
import jax
import jax.numpy as jnp
from jax.experimental import pallas as pl
from jax.experimental.pallas import tpu as pltpu


def _build_position_encoder(dim_model: int, max_seq_dim: int = 700) -> jnp.ndarray:
    """Vectorized, numerically-identical reproduction of the PyTorch __init__ loops.

    pe[p, i]   = sin(p / 10000 ** (2*i / dim_model))   for even column index i
    pe[p, i+1] = cos(p / 10000 ** (2*i / dim_model))
    (literal reproduction: the exponent uses 2*i with i the even column index,
     exactly as in the reference module; assumes even dim_model.)
    """
    p = jnp.arange(max_seq_dim, dtype=jnp.float32)[:, None]          # (P, 1)
    i = jnp.arange(0, dim_model, 2, dtype=jnp.float32)[None, :]      # (1, D/2)
    denom = jnp.power(jnp.float32(10000.0), (2.0 * i) / jnp.float32(dim_model))
    angles = p / denom                                                # (P, D/2)
    pe = jnp.zeros((max_seq_dim, dim_model), dtype=jnp.float32)
    pe = pe.at[:, 0::2].set(jnp.sin(angles))
    pe = pe.at[:, 1::2].set(jnp.cos(angles))
    return pe                                                         # (P, D)


def _pe_add_kernel(x_ref, pe_ref, o_ref):
    # x_ref: (TB, TF), pe_ref: (1, TF) f32 -> sublane-broadcast add on the VPU,
    # performed in f32 (matches PyTorch promotion of x + f32 buffer).
    o_ref[...] = (x_ref[...].astype(jnp.float32) + pe_ref[...]).astype(o_ref.dtype)


def _choose_tiles(batch: int, flat: int, x_itemsize: int,
                  target_block_bytes: int = 2 << 20):
    """Pick (TB, TF); one x block ~2 MiB, layout-legal, dtype-aware packing.

    TB: full B when B is below the sublane pack (8 for 4-byte, 16 for 2-byte,
        32 for 1-byte dtypes), else the pack size -> fully packed vregs.
    TF: full F when it fits the budget, else the largest multiple of 128 under
        target_block_bytes.

    VMEM footprint (default 2-deep buffering), *including* the sublane padding
    of the 1-row PE block (pads to 8 f32 sublanes):
        2*TB*TF*isz (x) + 2*TB*TF*osz (out) + 2*8*TF*4 (PE)
    ~= 12 MiB at the defaults -> fits v5e's 16 MiB scoped default.
    """
    if x_itemsize >= 4:
        pack = 8
    elif x_itemsize == 2:
        pack = 16
    else:
        pack = 32
    tb = batch if batch < pack else pack

    max_tf = max(128, ((target_block_bytes // (tb * x_itemsize)) // 128) * 128)
    tf = flat if flat <= max_tf else max_tf

    # v7x megacore occupancy: if the whole problem collapsed to a single grid
    # step but is big enough to be worth splitting, give the leading (parallel)
    # F axis at least 2 tiles so both TensorCores get work.  Tiny inputs stay
    # single-tile (launch overhead dominates there anyway).
    if (batch <= tb and flat <= tf and flat >= 4 * 128
            and batch * flat * x_itemsize >= (4 << 20)):
        half = pl.cdiv(flat, 2)
        tf = max(128, pl.cdiv(half, 128) * 128)

    return tb, tf


def positional_encoder_forward(x: jnp.ndarray, pe_flat: jnp.ndarray) -> jnp.ndarray:
    """x: (B, S, D); pe_flat: (1, S*D) float32.  Returns x + pe (f32 add)."""
    B, S, D = x.shape
    F = S * D
    assert pe_flat.shape == (1, F)

    out_dtype = jnp.result_type(x.dtype, pe_flat.dtype)   # match torch promotion
    x2 = x.reshape(B, F)

    x_isz = jnp.dtype(x.dtype).itemsize
    o_isz = jnp.dtype(out_dtype).itemsize
    TB, TF = _choose_tiles(B, F, x_isz)
    grid = (pl.cdiv(F, TF), pl.cdiv(B, TB))   # batch innermost -> PE resident

    out2 = pl.pallas_call(
        _pe_add_kernel,
        out_shape=jax.ShapeDtypeStruct((B, F), out_dtype),
        grid_spec=pltpu.PrefetchScalarGridSpec(
            num_scalar_prefetch=0,
            grid=grid,
            in_specs=[
                pl.BlockSpec((TB, TF), lambda f, b: (b, f)),
                # PE block index only depends on f (outer axis) -> DMA'd once
                # per f-tile, resident across all consecutive batch steps.
                pl.BlockSpec((1, TF), lambda f, b: (0, f)),
            ],
            out_specs=pl.BlockSpec((TB, TF), lambda f, b: (b, f)),
        ),
        compiler_params=pltpu.CompilerParams(
            dimension_semantics=("parallel", "parallel"),
        ),
        cost_estimate=pl.CostEstimate(
            flops=B * F,
            transcendentals=0,
            # x read + out write per element; PE fetched once per f-tile.
            bytes_accessed=B * F * (x_isz + o_isz) + F * 4,
        ),
    )(x2, pe_flat)

    return out2.reshape(B, S, D)


class PositionalEncoder:
    """JAX/Pallas counterpart of the PyTorch module (forward pass only)."""

    def __init__(self, dim_model: int, max_seq_dim: int = 700):
        self.dim_model = dim_model
        self.max_seq_dim = max_seq_dim
        self.pe_table = _build_position_encoder(dim_model, max_seq_dim)  # (P, D) f32
        self._pe_flat_cache = {}  # seq_len -> (1, S*D) f32, hoisted off the hot path

    def _pe_flat(self, seq_len: int) -> jnp.ndarray:
        pe = self._pe_flat_cache.get(seq_len)
        if pe is None:
            pe = self.pe_table[:seq_len, :].reshape(1, seq_len * self.dim_model)
            self._pe_flat_cache[seq_len] = pe
        return pe

    def __call__(self, x: jnp.ndarray) -> jnp.ndarray:
        _, S, D = x.shape
        assert D == self.dim_model and S <= self.max_seq_dim
        return positional_encoder_forward(x, self._pe_flat(S))


if __name__ == "__main__":
    # Small shapes consistent with the module: batch=2, seq=8, dim_model=32.
    B, S, D = 2, 8, 32
    enc = PositionalEncoder(dim_model=D, max_seq_dim=700)

    key = jax.random.PRNGKey(0)
    x = jax.random.normal(key, (B, S, D), dtype=jnp.float32)

    out = positional_encoder_forward(x, enc._pe_flat(S))
    out = jax.block_until_ready(out)

    # Sanity check against a pure-JAX reference of the forward pass.
    ref = x + enc.pe_table[None, :S, :]
    assert out.shape == (B, S, D)
    assert out.dtype == ref.dtype
    assert jnp.allclose(out, ref, atol=1e-6), "mismatch vs reference"

    print("KERNEL_OK")
</pallas_src>

<mosaic_0001>
module attributes {stable_mosaic.version = 11 : i64} {
  func.func @_pe_add_kernel(%arg0: i32, %arg1: i32, %arg2: memref<2x256xf32, #tpu.memory_space<vmem>>, %arg3: memref<1x256xf32, #tpu.memory_space<vmem>>, %arg4: memref<2x256xf32, #tpu.memory_space<vmem>>) attributes {dimension_semantics = [#tpu.dimension_semantics<parallel>, #tpu.dimension_semantics<parallel>], iteration_bounds = array<i64: 1, 1>, scalar_prefetch = 0 : i64, scratch_operands = 0 : i64, tpu.core_type = #tpu.core_type<tc>, window_params = [{transform_indices = @transform_0, window_bounds = array<i64: 2, 256>}, {transform_indices = @transform_1, window_bounds = array<i64: 1, 256>}, {transform_indices = @transform_2, window_bounds = array<i64: 2, 256>}]} {
    %c0 = arith.constant 0 : index
    %c0_0 = arith.constant 0 : index
    %0 = vector.load %arg2[%c0, %c0_0] : memref<2x256xf32, #tpu.memory_space<vmem>>, vector<2x256xf32>
    %c0_1 = arith.constant 0 : index
    %c0_2 = arith.constant 0 : index
    %1 = vector.load %arg3[%c0_1, %c0_2] : memref<1x256xf32, #tpu.memory_space<vmem>>, vector<1x256xf32>
    %2 = vector.broadcast %1 : vector<1x256xf32> to vector<2x256xf32>
    %3 = arith.addf %0, %2 : vector<2x256xf32>
    %c0_3 = arith.constant 0 : index
    %c0_4 = arith.constant 0 : index
    %4 = vector.load %arg4[%c0_3, %c0_4] : memref<2x256xf32, #tpu.memory_space<vmem>>, vector<2x256xf32>
    tpu.vector_store %arg4[%c0_3, %c0_4], %3 {strides = array<i32>} : memref<2x256xf32, #tpu.memory_space<vmem>>, vector<2x256xf32>,
    return
  }
  func.func @transform_0(%arg0: i32, %arg1: i32) -> (i32, i32) {
    %c0_i32 = arith.constant 0 : i32
    return %arg1, %arg0 : i32, i32
  }
  func.func @transform_1(%arg0: i32, %arg1: i32) -> (i32, i32) {
    %c0_i32 = arith.constant 0 : i32
    %c0_i32_0 = arith.constant 0 : i32
    return %c0_i32, %arg0 : i32, i32
  }
  func.func @transform_2(%arg0: i32, %arg1: i32) -> (i32, i32) {
    %c0_i32 = arith.constant 0 : i32
    return %arg1, %arg0 : i32, i32
  }
}

</mosaic_0001>

<bundles_post_ra>
// kernel: tpu_custom_call.1
= control target key start
LH: loop header
LB: loop body
LE: loop exit
PB: predicated region body
PF: predicated region fallthrough
CT: control target
= control target key end

     0   :  { %7 = vsyncpa [#allocation3], 0  ;;  %s172_s0 = inlined_call_operand.hbm [shape: f32[2,256], index: 0, kind: input, shape index: {}]   ;;  %s173_s1 = inlined_call_operand.hbm [shape: f32[1,256], index: 1, kind: input, shape index: {}]   ;;  %s174_s2 = inlined_call_operand.hbm [shape: f32[2,256], index: 2, kind: output, shape index: {}]  }
   0x1   :  { %8 = vsyncpa [#allocation6], 0 }
   0x2   :  { %9 = vsyncpa [#allocation4], 0  ;;  %s144_s9 = smov [#allocation2]   ;;  %s145_s11 = smov [#allocation5]  }
   0x3   :  { %s16_s10 = sshll.u32 %s144_s9, 4  ;;  %s26_s12 = sshll.u32 %s145_s11, 4  ;;  %s17_s10 = int_to_ptr.vmem [resolvable:$true] %s16_s10  ;;  %s27_s12 = int_to_ptr.vmem [resolvable:$true] %s26_s12 }
   0x4   :  { %s86_s13 = scalar_lea.vmem %s17_s10, 64  ;;  %p91_p1 = scmp.lt.s32.totalorder %s17_s10, %s17_s10 }
   0x5   :  { %p87_p0 = scmp.ne.s32.totalorder %s17_s10, %s86_s13  ;;  %p92_p2 = scmp.lt.s32.totalorder %s86_s13, %s86_s13 }
   0x7   :  { %p93_p3 = por %p92_p2, %p91_p1 }
   0x9   :  { %p94_p4 = pnand %p93_p3, %p87_p0 }
   0xb   :  { %97 = shalt.err (!%p94_p4)
}
   0xc   :  { %19 = dma.hbm_to_vmem [thread:$0]  %s172_s0, 64, %s17_s10, [#allocation3]  }
   0xd   :  { %s106_s16 = scalar_lea.vmem %s27_s12, 32  ;;  %p111_p6 = scmp.lt.s32.totalorder %s27_s12, %s27_s12 }
   0xe   :  { %p107_p5 = scmp.ne.s32.totalorder %s27_s12, %s106_s16  ;;  %p112_p7 = scmp.lt.s32.totalorder %s106_s16, %s106_s16 }
  0x10   :  { %p113_p8 = por %p112_p7, %p111_p6 }
  0x12   :  { %p114_p9 = pnand %p113_p8, %p107_p5 }
  0x14   :  { %117 = shalt.err (!%p114_p9)
}
  0x15   :  { %29 = dma.hbm_to_vmem [thread:$0]  %s173_s1, 32, %s27_s12, [#allocation6]  }
  0x16   :  { %138 = dma.done.wait [#allocation3], 64  }
  0x17   :  { %139 = vsyncadd [#allocation3], 4294967232 }
  0x18   :  { %140 = dma.done.wait [#allocation6], 32  }
  0x19   :  { %141 = vsyncadd [#allocation6], 4294967264  ;;  %v39_v0 = vlaneseq  ;;  %v146_v1 = vmov 1983009808   ;;  %v37_v7 = vld [vmem:[#allocation5] sm:$0x3] }
  0x1a   :  { %v49_v2 = vunpack.c.l.s4 %v146_v1  ;;  %v36_v12 = vld [vmem:[#allocation2] sm:$0xf]  ;;  %s147_s0 = smov [#allocation7]  }
  0x1b   :  { %v40_v3 = vshrl.u32 %v39_v0, 7  ;;  %s64_s19 = sshll.u32 %s147_s0, 4  ;;  %s65_s19 = int_to_ptr.vmem [resolvable:$true] %s64_s19 }
  0x1c   :  { %v50_v6 = vunpack.c.0.s8 %v49_v2  ;;  %s118_s1 = scalar_lea.vmem %s65_s19, 64  ;;  %p123_p11 = scmp.lt.s32.totalorder %s65_s19, %s65_s19 }
  0x1d   :  { %v41_v4 = vsub.s32 0, %v40_v3  ;;  %v45_v5 = vsub.s32 1, %v40_v3  ;;  %p119_p10 = scmp.ne.s32.totalorder %s65_s19, %s118_s1  ;;  %p124_p12 = scmp.lt.s32.totalorder %s118_s1, %s118_s1 }
  0x1e   :  { %v53_v10 = vsub.s32 %v50_v6, %v40_v3 }
  0x1f   :  { %v42_v8 = vrot.slane %v37_v7, %v41_v4  ;;  %v46_v9 = vrot.slane %v37_v7, %v45_v5  ;;  %p125_p13 = por %p124_p12, %p123_p11 }
  0x21   :  { %v47_v11 = vcombine.low %v42_v8, %v46_v9  ;;  %p126_p0 = pnand %p125_p13, %p119_p10 }
  0x23   :  { %v54_v13 = vrot.slane %v47_v11, %v53_v10 }
  0x25   :  { %v56_v14 = vadd.f32 %v54_v13, %v36_v12 }
  0x27   :  { %57 = vst [vmem:[#allocation7] sm:$0xf] %v56_v14 }
  0x28   :  { %129 = shalt.err (!%p126_p0)
}
  0x29   :  { %67 = dma.vmem_to_hbm [thread:$0]  %s65_s19, 64, %s174_s2, [#allocation4]  }
  0x2a   :  { %142 = dma.done.wait [#allocation4], 64  }
  0x2b   :  { %143 = vsyncadd [#allocation4], 4294967232 }
  0x2c   :  { %71 = vsyncpa [#allocation3], 1 }
  0x2d   :  { %72 = vsyncpa [#allocation6], 1 }
  0x2e   :  { %73 = vsyncpa [#allocation4], 1 }

</bundles_post_ra>
